<compile_context>
chip_gen: v7x
topology: tpu7x:2x2x1
jax: 0.10.0
libtpu: 0.0.40
codegen_flags: <defaults>
</compile_context>

<pallas_src>
import functools

import jax
import jax.numpy as jnp
from jax.experimental import pallas as pl
from jax.experimental.pallas import tpu as pltpu


def _cdiv(a, b):
    return -(-a // b)


def _round_up(a, b):
    return _cdiv(a, b) * b


def _pad2d(a, rows, cols, dtype=None):
    if dtype is not None and a.dtype != dtype:
        a = a.astype(dtype)
    r, c = a.shape
    if r == rows and c == cols:
        return a
    return jnp.pad(a, ((0, rows - r), (0, cols - c)))


_VMEM_CAP = None


def _vmem_capacity_bytes():
    """Physical VMEM per core (64 MiB v7x, 128 MiB v5e/v6e); safe fallback."""
    global _VMEM_CAP
    if _VMEM_CAP is None:
        cap = 64 << 20                      # conservative default (v7x-sized)
        try:
            info = pltpu.get_tpu_info()
            cap = int(getattr(info, "vmem_capacity_bytes", cap)) or cap
        except Exception:
            pass
        _VMEM_CAP = cap
    return _VMEM_CAP


def _footprint_bytes(tm, tf, d_p, x_bpe, out_bpe, c_bpe, multi_k):
    """Conservative VMEM footprint for one pipelined step (double-buffered)."""
    fp = 2 * tm * d_p * x_bpe               # x row tile
    fp += 2 * tm * d_p * out_bpe            # output row tile
    fp += 2 * d_p * tf * c_bpe              # W1 slice
    fp += 2 * tf * d_p * c_bpe              # W2 slice
    fp += 2 * 8 * (tf + d_p) * 4            # f32 biases (sublane padded)
    fp += tm * tf * (4 + c_bpe)             # h in f32 + cast copy for matmul2
    fp += tm * d_p * 4                      # f32 result before output cast
    if multi_k:
        fp += tm * d_p * 4                  # f32 accumulator scratch
    return fp


def _plan(N, d_model, ffn_dim, tm_req, x_bpe, out_bpe, c_bpe, budget):
    """Static tiling plan -> (tm, tf, ffn_pad, d_p, n_row_tiles, multi_k)."""
    d_p = _round_up(d_model, 128)
    ffn_p = _round_up(ffn_dim, 128)

    # Row-tile cap: requested tm rounded to 16 (bf16 min tile), never larger
    # than the padded row count, and small enough that the "parallel" row
    # axis has >=2 tiles (lets v7x's two TensorCores both work).
    tm_cap = max(16, min(_round_up(tm_req, 16), _round_up(N, 16)))
    if N > 16:
        tm_cap = min(tm_cap, _round_up(_cdiv(N, 2), 16))

    tm = tm_cap
    while True:
        n_tiles = _cdiv(N, tm)
        # Balance tiles so row padding is < 16 rows per tile (no ~2x waste).
        tm_eff = max(16, _round_up(_cdiv(N, n_tiles), 16))

        # (a) Weights fully resident in VMEM -> ffn grid collapses to 1,
        #     weights fetched once, no accumulator needed.
        if _footprint_bytes(tm_eff, ffn_p, d_p, x_bpe, out_bpe, c_bpe,
                            False) <= budget:
            return tm_eff, ffn_p, ffn_p, d_p, n_tiles, False

        # (b) Stream weights over the ffn axis; tf a multiple of 256 to keep
        #     the v6e/v7x 2x256^2 MXU fully fed (128 only if ffn is tiny).
        gran = 256 if ffn_p >= 256 else 128
        tf = gran
        while tf * 2 < ffn_p and _footprint_bytes(
                tm_eff, tf * 2, d_p, x_bpe, out_bpe, c_bpe, True) <= budget:
            tf *= 2

        if tf >= ffn_p:
            # Nothing to stream (ffn fits a single slice): resident structure
            # is the only option; keep shrinking rows if still over budget.
            if tm <= 16:
                return tm_eff, ffn_p, ffn_p, d_p, n_tiles, False
        else:
            if _footprint_bytes(tm_eff, tf, d_p, x_bpe, out_bpe, c_bpe,
                                True) <= budget or tm <= 16:
                return tm_eff, tf, _round_up(ffn_p, tf), d_p, n_tiles, True

        tm = max(16, _round_up(tm // 2, 16))   # shrink row tile and retry


def _ffn_kernel_resident(x_ref, w1_ref, b1_ref, w2_ref, b2_ref, o_ref,
                         *, compute_dtype):
    # Weights are grid-invariant; single ffn step -> write output directly.
    x = x_ref[...].astype(compute_dtype)
    h = jnp.dot(x, w1_ref[...], preferred_element_type=jnp.float32)
    h = jnp.maximum(h + b1_ref[...], 0.0)
    # dropout: identity (inference)
    out = jnp.dot(h.astype(compute_dtype), w2_ref[...],
                  preferred_element_type=jnp.float32)
    o_ref[...] = (out + b2_ref[...]).astype(o_ref.dtype)


def _ffn_kernel_tiled(x_ref, w1_ref, b1_ref, w2_ref, b2_ref, o_ref, acc_ref,
                      *, compute_dtype):
    # ffn axis streamed; the plan guarantees num_programs(1) >= 2.
    k = pl.program_id(1)
    nk = pl.num_programs(1)

    x = x_ref[...].astype(compute_dtype)
    h = jnp.dot(x, w1_ref[...], preferred_element_type=jnp.float32)
    h = jnp.maximum(h + b1_ref[...], 0.0)
    # dropout: identity (inference)
    part = jnp.dot(h.astype(compute_dtype), w2_ref[...],
                   preferred_element_type=jnp.float32)

    @pl.when(k == 0)
    def _first():                     # overwrite -> no zero-fill pass
        acc_ref[...] = part

    @pl.when(jnp.logical_and(k > 0, k < nk - 1))
    def _middle():
        acc_ref[...] += part

    @pl.when(k == nk - 1)
    def _last():                      # fuse final partial into output store
        o_ref[...] = (acc_ref[...] + part + b2_ref[...]).astype(o_ref.dtype)


@functools.partial(
    jax.jit, static_argnames=("tm", "compute_dtype", "vmem_budget_bytes"))
def feed_forward_module(x, w1, b1, w2, b2, tm=512,
                        compute_dtype=jnp.bfloat16, vmem_budget_bytes=None):
    """x: (B, L, d_model) -> (B, L, d_model).

    w1: (d_model, ffn_dim), b1: (1, ffn_dim), w2: (ffn_dim, d_model),
    b2: (1, d_model).  (Conv1d kernel_size=1 weights, squeezed.)
    """
    B, L, d_model = x.shape
    ffn_dim = w1.shape[1]
    N = B * L

    c_bpe = jnp.dtype(compute_dtype).itemsize
    out_bpe = x.dtype.itemsize
    x_bpe_plan = max(x.dtype.itemsize, c_bpe)   # conservative (padded/native)

    cap = _vmem_capacity_bytes()
    budget = int(vmem_budget_bytes) if vmem_budget_bytes else int(cap * 0.80)

    tm_eff, tf_eff, ffn_pad, d_p, n_tiles, multi_k = _plan(
        N, d_model, ffn_dim, tm, x_bpe_plan, out_bpe, c_bpe, budget)
    n_p = n_tiles * tm_eff

    # ---- Operand prep (zero padding is exact for this FFN). NOTE: callers
    # running many forward passes should pre-pad/pre-cast the weights once
    # outside their step function and pass the cached copies in.
    w1p = _pad2d(w1, d_p, ffn_pad, compute_dtype)
    w2p = _pad2d(w2, ffn_pad, d_p, compute_dtype)
    b1p = _pad2d(b1, 1, ffn_pad, jnp.float32)
    b2p = _pad2d(b2, 1, d_p, jnp.float32)

    x2d = x.reshape(N, d_model)
    if not (N == n_p and d_model == d_p):
        # Padding required: fuse the pad with the cast (single pass over x).
        x2d = _pad2d(x2d, n_p, d_p, compute_dtype)
    # else: pass native dtype; the in-kernel VPU cast hides under the MXU and
    # we skip a full HBM read+write pass over the activations.

    fp = _footprint_bytes(tm_eff, tf_eff, d_p, x2d.dtype.itemsize, out_bpe,
                          c_bpe, multi_k)
    vmem_limit = int(min(max(int(fp * 1.3), 32 << 20), cap))

    if multi_k:
        grid = (n_tiles, ffn_pad // tf_eff)
        kernel = functools.partial(_ffn_kernel_tiled,
                                   compute_dtype=compute_dtype)
        in_specs = [
            pl.BlockSpec((tm_eff, d_p), lambda i, k: (i, 0)),   # X rows
            pl.BlockSpec((d_p, tf_eff), lambda i, k: (0, k)),   # W1 slice
            pl.BlockSpec((1, tf_eff), lambda i, k: (0, k)),     # b1 slice
            pl.BlockSpec((tf_eff, d_p), lambda i, k: (k, 0)),   # W2 slice
            pl.BlockSpec((1, d_p), lambda i, k: (0, 0)),        # b2
        ]
        out_specs = pl.BlockSpec((tm_eff, d_p), lambda i, k: (i, 0))
        scratch = [pltpu.VMEM((tm_eff, d_p), jnp.float32)]
        semantics = ("parallel", "arbitrary")
    else:
        grid = (n_tiles,)
        kernel = functools.partial(_ffn_kernel_resident,
                                   compute_dtype=compute_dtype)
        in_specs = [
            pl.BlockSpec((tm_eff, d_p), lambda i: (i, 0)),      # X rows
            pl.BlockSpec((d_p, tf_eff), lambda i: (0, 0)),      # W1 (resident)
            pl.BlockSpec((1, tf_eff), lambda i: (0, 0)),        # b1 (resident)
            pl.BlockSpec((tf_eff, d_p), lambda i: (0, 0)),      # W2 (resident)
            pl.BlockSpec((1, d_p), lambda i: (0, 0)),           # b2 (resident)
        ]
        out_specs = pl.BlockSpec((tm_eff, d_p), lambda i: (i, 0))
        scratch = []
        semantics = ("parallel",)

    out2d = pl.pallas_call(
        kernel,
        out_shape=jax.ShapeDtypeStruct((n_p, d_p), x.dtype),
        grid_spec=pltpu.PrefetchScalarGridSpec(
            num_scalar_prefetch=0,
            grid=grid,
            in_specs=in_specs,
            out_specs=out_specs,
            scratch_shapes=scratch,
        ),
        compiler_params=pltpu.CompilerParams(
            dimension_semantics=semantics,
            vmem_limit_bytes=vmem_limit,
        ),
    )(x2d, w1p, b1p, w2p, b2p)

    return out2d[:N, :d_model].reshape(B, L, d_model)


def reference(x, w1, b1, w2, b2):
    h = jnp.maximum(jnp.einsum("bld,df->blf", x, w1) + b1[0], 0.0)
    return jnp.einsum("blf,fd->bld", h, w2) + b2[0]


def _make_params(key, d_model, ffn_dim):
    k1, k2, k3, k4 = jax.random.split(key, 4)
    bound1 = 1.0 / (d_model ** 0.5)
    bound2 = 1.0 / (ffn_dim ** 0.5)
    w1 = jax.random.uniform(k1, (d_model, ffn_dim), jnp.float32, -bound1, bound1)
    b1 = jax.random.uniform(k2, (1, ffn_dim), jnp.float32, -bound1, bound1)
    w2 = jax.random.uniform(k3, (ffn_dim, d_model), jnp.float32, -bound2, bound2)
    b2 = jax.random.uniform(k4, (1, d_model), jnp.float32, -bound2, bound2)
    return w1, b1, w2, b2


if __name__ == "__main__":
    key = jax.random.PRNGKey(0)
    kx1, kp1, kx2, kp2 = jax.random.split(key, 4)

    # --- Test 1: small shapes from the module spec (resident-weight path,
    # bf16 MXU matmuls with f32 accumulation). batch=2, seq=8, d_model=32,
    # ffn_dim=64.
    B, L, d_model, ffn_dim = 2, 8, 32, 64
    x = jax.random.normal(kx1, (B, L, d_model), dtype=jnp.float32)
    w1, b1, w2, b2 = _make_params(kp1, d_model, ffn_dim)
    ref = reference(x, w1, b1, w2, b2)

    out = jax.block_until_ready(feed_forward_module(x, w1, b1, w2, b2))
    assert out.shape == (B, L, d_model)
    scale = jnp.max(jnp.abs(ref)) + 1e-6
    rel_err = jnp.max(jnp.abs(out - ref)) / scale
    assert rel_err < 5e-2, f"bf16 path mismatch (rel_err={rel_err})"

    # --- Test 2: f32 compute path, tight correctness check (resident path).
    out_f32 = jax.block_until_ready(
        feed_forward_module(x, w1, b1, w2, b2, compute_dtype=jnp.float32))
    assert jnp.allclose(out_f32, ref, atol=1e-4, rtol=1e-4), \
        "f32 resident path mismatch vs reference"

    # --- Test 3: force the streamed-weight (multi-k) kernel by shrinking the
    # VMEM budget; exercises the accumulator + fused last-step path.
    B2, L2, d2, ffn2 = 2, 40, 32, 320
    x3 = jax.random.normal(kx2, (B2, L2, d2), dtype=jnp.float32)
    w1b, b1b, w2b, b2b = _make_params(kp2, d2, ffn2)
    ref3 = reference(x3, w1b, b1b, w2b, b2b)
    out3 = jax.block_until_ready(
        feed_forward_module(x3, w1b, b1b, w2b, b2b,
                            compute_dtype=jnp.float32,
                            vmem_budget_bytes=900_000))
    assert jnp.allclose(out3, ref3, atol=1e-4, rtol=1e-4), \
        "f32 streamed-weight path mismatch vs reference"

    print("KERNEL_OK")
</pallas_src>

<mosaic_0001>
module attributes {stable_mosaic.version = 11 : i64} {
  func.func @_ffn_kernel_resident(%arg0: i32, %arg1: memref<16x128xbf16, #tpu.memory_space<vmem>>, %arg2: memref<128x128xbf16, #tpu.memory_space<vmem>>, %arg3: memref<1x128xf32, #tpu.memory_space<vmem>>, %arg4: memref<128x128xbf16, #tpu.memory_space<vmem>>, %arg5: memref<1x128xf32, #tpu.memory_space<vmem>>, %arg6: memref<16x128xf32, #tpu.memory_space<vmem>>) attributes {dimension_semantics = [#tpu.dimension_semantics<parallel>], iteration_bounds = array<i64: 1>, scalar_prefetch = 0 : i64, scratch_operands = 0 : i64, tpu.core_type = #tpu.core_type<tc>, window_params = [{transform_indices = @transform_0, window_bounds = array<i64: 16, 128>}, {pipeline_mode = #tpu.pipeline_mode<synchronous>, transform_indices = @transform_1, window_bounds = array<i64: 128, 128>}, {pipeline_mode = #tpu.pipeline_mode<synchronous>, transform_indices = @transform_2, window_bounds = array<i64: 1, 128>}, {pipeline_mode = #tpu.pipeline_mode<synchronous>, transform_indices = @transform_3, window_bounds = array<i64: 128, 128>}, {pipeline_mode = #tpu.pipeline_mode<synchronous>, transform_indices = @transform_4, window_bounds = array<i64: 1, 128>}, {transform_indices = @transform_5, window_bounds = array<i64: 16, 128>}]} {
    %c0 = arith.constant 0 : index
    %c0_0 = arith.constant 0 : index
    %0 = vector.load %arg1[%c0, %c0_0] : memref<16x128xbf16, #tpu.memory_space<vmem>>, vector<16x128xbf16>
    %c0_1 = arith.constant 0 : index
    %c0_2 = arith.constant 0 : index
    %1 = vector.load %arg2[%c0_1, %c0_2] : memref<128x128xbf16, #tpu.memory_space<vmem>>, vector<128x128xbf16>
    %cst = arith.constant dense<0.000000e+00> : vector<16x128xf32>
    %2 = tpu.matmul %0, %1, %cst {dimension_numbers = #tpu.dot_dimension_numbers<[1], [0], [0], [1], [0, 0, 1, 1], [], []>} : vector<16x128xbf16>, vector<128x128xbf16>, vector<16x128xf32> -> vector<16x128xf32>
    %c0_3 = arith.constant 0 : index
    %c0_4 = arith.constant 0 : index
    %3 = vector.load %arg3[%c0_3, %c0_4] : memref<1x128xf32, #tpu.memory_space<vmem>>, vector<1x128xf32>
    %4 = vector.broadcast %3 : vector<1x128xf32> to vector<16x128xf32>
    %5 = arith.addf %2, %4 : vector<16x128xf32>
    %cst_5 = arith.constant 0.000000e+00 : f32
    %6 = vector.broadcast %cst_5 : f32 to vector<16x128xf32>
    %7 = arith.maximumf %5, %6 : vector<16x128xf32>
    %8 = arith.truncf %7 : vector<16x128xf32> to vector<16x128xbf16>
    %c0_6 = arith.constant 0 : index
    %c0_7 = arith.constant 0 : index
    %9 = vector.load %arg4[%c0_6, %c0_7] : memref<128x128xbf16, #tpu.memory_space<vmem>>, vector<128x128xbf16>
    %cst_8 = arith.constant dense<0.000000e+00> : vector<16x128xf32>
    %10 = tpu.matmul %8, %9, %cst_8 {dimension_numbers = #tpu.dot_dimension_numbers<[1], [0], [0], [1], [0, 0, 1, 1], [], []>} : vector<16x128xbf16>, vector<128x128xbf16>, vector<16x128xf32> -> vector<16x128xf32>
    %c0_9 = arith.constant 0 : index
    %c0_10 = arith.constant 0 : index
    %11 = vector.load %arg5[%c0_9, %c0_10] : memref<1x128xf32, #tpu.memory_space<vmem>>, vector<1x128xf32>
    %12 = vector.broadcast %11 : vector<1x128xf32> to vector<16x128xf32>
    %13 = arith.addf %10, %12 : vector<16x128xf32>
    %c0_11 = arith.constant 0 : index
    %c0_12 = arith.constant 0 : index
    %14 = vector.load %arg6[%c0_11, %c0_12] : memref<16x128xf32, #tpu.memory_space<vmem>>, vector<16x128xf32>
    tpu.vector_store %arg6[%c0_11, %c0_12], %13 {strides = array<i32>} : memref<16x128xf32, #tpu.memory_space<vmem>>, vector<16x128xf32>,
    return
  }
  func.func @transform_0(%arg0: i32) -> (i32, i32) {
    %c0_i32 = arith.constant 0 : i32
    %c0_i32_0 = arith.constant 0 : i32
    return %arg0, %c0_i32 : i32, i32
  }
  func.func @transform_1(%arg0: i32) -> (i32, i32) {
    %c0_i32 = arith.constant 0 : i32
    %c0_i32_0 = arith.constant 0 : i32
    %c0_i32_1 = arith.constant 0 : i32
    return %c0_i32, %c0_i32_0 : i32, i32
  }
  func.func @transform_2(%arg0: i32) -> (i32, i32) {
    %c0_i32 = arith.constant 0 : i32
    %c0_i32_0 = arith.constant 0 : i32
    %c0_i32_1 = arith.constant 0 : i32
    return %c0_i32, %c0_i32_0 : i32, i32
  }
  func.func @transform_3(%arg0: i32) -> (i32, i32) {
    %c0_i32 = arith.constant 0 : i32
    %c0_i32_0 = arith.constant 0 : i32
    %c0_i32_1 = arith.constant 0 : i32
    return %c0_i32, %c0_i32_0 : i32, i32
  }
  func.func @transform_4(%arg0: i32) -> (i32, i32) {
    %c0_i32 = arith.constant 0 : i32
    %c0_i32_0 = arith.constant 0 : i32
    %c0_i32_1 = arith.constant 0 : i32
    return %c0_i32, %c0_i32_0 : i32, i32
  }
  func.func @transform_5(%arg0: i32) -> (i32, i32) {
    %c0_i32 = arith.constant 0 : i32
    %c0_i32_0 = arith.constant 0 : i32
    return %arg0, %c0_i32 : i32, i32
  }
}

</mosaic_0001>

<bundles_post_ra>
// kernel: feed_forward_module.1
= control target key start
LH: loop header
LB: loop body
LE: loop exit
PB: predicated region body
PF: predicated region fallthrough
CT: control target
= control target key end

     0   :  { %v358_v0 = vmov 0.0   ;;  %vm359_vm0 = vmmov 0   ;;  %s453_s1 = inlined_call_operand.vmem [shape: bf16[128,128], index: 1, kind: input, shape index: {}]   ;;  %s454_s3 = inlined_call_operand.vmem [shape: bf16[128,128], index: 3, kind: input, shape index: {}]   ;;  %s455_s0 = inlined_call_operand.vmem [shape: bf16[16,128], index: 0, kind: input, shape index: {}]   ;;  %s456_s2 = inlined_call_operand.vmem [shape: f32[1,128], index: 2, kind: input, shape index: {}]   ;;  %s457_s4 = inlined_call_operand.vmem [shape: f32[1,128], index: 4, kind: input, shape index: {}]   ;;  %s458_s5 = inlined_call_operand.vmem [shape: f32[16,128], index: 5, kind: output, shape index: {}]  }
   0x1   :  { %299 = vmatprep.subr.bf16.mxu0 %v358_v0  ;;  %v341_v1 = vld [vmem:[%s453_s1] sm:$0xff]   ;;  %315 = vmatprep.mubr.msk.bf16.mxu0 %vm359_vm0, %v358_v0  ;;  %v342_v2 = vld [vmem:[%s453_s1 + $0x8] sm:$0xff]   ;;  %v343_v3 = vld [vmem:[%s453_s1 + $0x10] sm:$0xff]  }
   0x2   :  { %319 = vmatprep.subr.bf16.mxu1 %v358_v0  ;;  %335 = vmatprep.mubr.msk.bf16.mxu1 %vm359_vm0, %v358_v0  ;;  %v350_v4 = vld [vmem:[%s454_s3] sm:$0xff]   ;;  %v344_v5 = vld [vmem:[%s453_s1 + $0x18] sm:$0xff]   ;;  %v351_v6 = vld [vmem:[%s454_s3 + $0x8] sm:$0xff]  }
   0x3   :  { %300 = vmatpush3.bf16.msra.mxu0 %v341_v1  ;;  %320 = vmatpush3.bf16.msra.mxu1 %v350_v4  ;;  %v345_v7 = vld [vmem:[%s453_s1 + $0x20] sm:$0xff]   ;;  %v352_v8 = vld [vmem:[%s454_s3 + $0x10] sm:$0xff]   ;;  %v346_v9 = vld [vmem:[%s453_s1 + $0x28] sm:$0xff]  }
   0x4   :  { %301 = vmatprep.subr.bf16.mxu0 %v358_v0  ;;  %321 = vmatprep.subr.bf16.mxu1 %v358_v0  ;;  %v353_v10 = vld [vmem:[%s454_s3 + $0x18] sm:$0xff]   ;;  %v347_v11 = vld [vmem:[%s453_s1 + $0x30] sm:$0xff]   ;;  %v354_v12 = vld [vmem:[%s454_s3 + $0x20] sm:$0xff]  }
   0x5   :  { %v348_v13 = vld [vmem:[%s453_s1 + $0x38] sm:$0xff]   ;;  %v355_v14 = vld [vmem:[%s454_s3 + $0x28] sm:$0xff]   ;;  %v349_v15 = vld [vmem:[%s455_s0] sm:$0xff]  }
   0x6   :  { %v356_v16 = vld [vmem:[%s454_s3 + $0x30] sm:$0xff]   ;;  %v357_v17 = vld [vmem:[%s454_s3 + $0x38] sm:$0xff]   ;;  %v262_v18 = vld [vmem:[%s456_s2] ss:$0 sm:$0xff] }
   0x7   :  { %302 = vmatpush3.bf16.msra.mxu0 %v342_v2  ;;  %322 = vmatpush3.bf16.msra.mxu1 %v351_v6  ;;  %v272_v28 = vld [vmem:[%s457_s4] ss:$0 sm:$0xff] }
   0x8   :  { %303 = vmatprep.subr.bf16.mxu0 %v358_v0  ;;  %323 = vmatprep.subr.bf16.mxu1 %v358_v0 }
   0xb   :  { %304 = vmatpush3.bf16.msra.mxu0 %v343_v3  ;;  %324 = vmatpush3.bf16.msra.mxu1 %v352_v8 }
   0xc   :  { %305 = vmatprep.subr.bf16.mxu0 %v358_v0  ;;  %325 = vmatprep.subr.bf16.mxu1 %v358_v0 }
   0xf   :  { %306 = vmatpush3.bf16.msra.mxu0 %v344_v5  ;;  %326 = vmatpush3.bf16.msra.mxu1 %v353_v10 }
  0x10   :  { %307 = vmatprep.subr.bf16.mxu0 %v358_v0  ;;  %327 = vmatprep.subr.bf16.mxu1 %v358_v0 }
  0x13   :  { %308 = vmatpush3.bf16.msra.mxu0 %v345_v7  ;;  %328 = vmatpush3.bf16.msra.mxu1 %v354_v12 }
  0x14   :  { %309 = vmatprep.subr.bf16.mxu0 %v358_v0  ;;  %329 = vmatprep.subr.bf16.mxu1 %v358_v0 }
  0x17   :  { %310 = vmatpush3.bf16.msra.mxu0 %v346_v9  ;;  %330 = vmatpush3.bf16.msra.mxu1 %v355_v14 }
  0x18   :  { %311 = vmatprep.subr.bf16.mxu0 %v358_v0  ;;  %331 = vmatprep.subr.bf16.mxu1 %v358_v0 }
  0x1b   :  { %312 = vmatpush3.bf16.msra.mxu0 %v347_v11  ;;  %332 = vmatpush3.bf16.msra.mxu1 %v356_v16 }
  0x1c   :  { %313 = vmatprep.subr.bf16.mxu0 %v358_v0  ;;  %333 = vmatprep.subr.bf16.mxu1 %v358_v0 }
  0x1f   :  { %314 = vmatpush3.bf16.msra.mxu0 %v348_v13  ;;  %334 = vmatpush3.bf16.msra.mxu1 %v357_v17 }
  0x22   :  { %316 = vmatmul.mubr.bf16.vlgmr.msra.gmra.mrb[0].mxu0 %v349_v15 }
  0xf5   :  { %v134_v19 = vpop.f32.mrb[0].mxu0 }
  0xf6   :  { %v135_v20 = vadd.f32 %v262_v18, %v134_v19  ;;  %v317_v21 = vpop.f32.mrb[1].mxu0 }
  0xf7   :  { %v137_v22 = vpop.f32.mrb[2].mxu0 }
  0xf8   :  { %v138_v23 = vadd.f32 %v262_v18, %v137_v22  ;;  %v318_v24 = vpop.f32.mrb[3].mxu0  ;;  %v141_v25 = vmax.f32 %v135_v20, 0.0 }
  0xfa   :  { %v142_v26 = vmax.f32 %v138_v23, 0.0 }
  0xfc   :  { %v143_v27 = vpack.c.bf16 %v142_v26, %v141_v25 }
  0xfe   :  { %336 = vmatmul.mubr.bf16.vlgmr.msra.gmra.mrb[0].mxu1 %v143_v27 }
 0x1d1   :  { %v249_v29 = vpop.f32.mrb[0].mxu1 }
 0x1d2   :  { %v250_v30 = vadd.f32 %v272_v28, %v249_v29  ;;  %v337_v31 = vpop.f32.mrb[1].mxu1 }
 0x1d3   :  { %v252_v32 = vpop.f32.mrb[2].mxu1 }
 0x1d4   :  { %256 = vst [vmem:[%s458_s5] sm:$0xff] %v250_v30  ;;  %v253_v33 = vadd.f32 %v272_v28, %v252_v32  ;;  %v338_v34 = vpop.f32.mrb[3].mxu1 }
 0x1d6   :  { %257 = vst [vmem:[%s458_s5 + $0x8] sm:$0xff] %v253_v33 }

</bundles_post_ra>
